<compile_context>
chip_gen: v6e
topology: v6e:2x2x1
jax: 0.10.0
libtpu: 0.0.40
codegen_flags: <defaults>
</compile_context>

<pallas_src>
import functools

import jax
import jax.numpy as jnp
from jax import lax
from jax.experimental import pallas as pl
from jax.experimental.pallas import tpu as pltpu


_VMEM_BUDGET = 24 << 20   # target bytes: pipeline buffers + resident weights
_VMEM_LIMIT = 40 << 20    # scoped-VMEM cap for Mosaic (v7x: 64 MiB physical)


# ----------------------------- tiling ----------------------------------------

def _pick_l_tile(l_out: int, c: int, itemsize: int, with_conv: bool) -> int:
    """Output (pair) rows per grid step along L, adapted to C and dtype.

    Budget = double-buffered (TL,2C) input + (TL,C) output blocks, the f32
    accumulator, plus the resident weights, held to ~24 MiB.  With the scoped
    VMEM limit raised to 40 MiB this fits every generation (v5e's 16 MiB
    default is overridden; v7x's 64 MiB physical keeps headroom for compiler
    scratch).  Small C -> TL=2048 (amortizes the ~0.35us/step grid overhead,
    mem-bound regime); C=512 f32 -> ~1.5k; C=1024 f32 -> ~430.
    """
    budget = _VMEM_BUDGET
    if with_conv:
        w_bufs = 1 if c >= 256 else 2                 # see _resident_spec
        budget -= w_bufs * 3 * c * c * itemsize       # w0 (C,C) + w12 (2C,C)
        budget -= 2 * 8 * 2 * c * itemsize            # (8,2C) halo block, dbl-buffered
    per_row = 2 * 3 * c * itemsize                    # dbl-buffered (TL,2C) in + (TL,C) out
    if with_conv:
        per_row += 4 * c                              # (TL,C) f32 accumulator
    tl = int(budget // max(per_row, 1))
    tl = max(128, min(tl, 2048))
    tl -= tl % 8                                      # sublane alignment / halo map
    return tl


def _align_tile(tl: int, l_out: int) -> int:
    """Clamp to a single full-extent tile, or keep TL a multiple of 8."""
    if l_out <= tl:
        return l_out
    return max(8, tl - tl % 8)


def _resident_spec(block_shape, index_map, single_buffer):
    """BlockSpec for a grid-invariant operand (weights).

    When the operand is big enough to matter (C >= 256 -> >= 0.75 MiB),
    request a single VMEM buffer: the block is never re-fetched, so the
    default double-buffering is pure VMEM waste (3*C^2*itemsize, e.g. 3 MiB
    at C=512 f32).  Falls back to the default spec on jax versions without
    BlockSpec.pipeline_mode.
    """
    if single_buffer:
        try:
            return pl.BlockSpec(block_shape, index_map, pipeline_mode=pl.Buffered(1))
        except (TypeError, AttributeError):
            pass
    return pl.BlockSpec(block_shape, index_map)


# ----------------------------- kernels ----------------------------------------

def _conv_down_kernel(x2_ref, halo_ref, w0_ref, w12_ref, b_ref, o_ref):
    """Conv1d(C, C, k=3, stride=2, pad=1) on one (batch, L-tile) block.

    x2_ref:   (TL, 2C) pair rows [x[2t] | x[2t+1]], C channels per half
    halo_ref: (8, 2C)  last 8 pair rows of the PREVIOUS L tile; row 7's odd
                       half is x[2*t0 - 1].  Contents ignored when j == 0.
    w0_ref:   (C, C)   tap k=0 weights:  w0[ci, co] = weight[co, ci, 0]
    w12_ref:  (2C, C)  taps k=1,2 stacked: [weight[:,:,1].T ; weight[:,:,2].T]
    b_ref:    (1, C)   bias (f32)
    o_ref:    (TL, C)  output rows t0 .. t0 + TL - 1,  t0 = j * TL
    """
    c = o_ref.shape[-1]
    j = pl.program_id(1)

    x2 = x2_ref[...]
    x_odd = x2[:, c:]                                # x[2t+1], contiguous lane slice

    # taps k=1 and k=2: a single K=2C MXU matmul straight off the input block.
    acc = jnp.dot(x2, w12_ref[...], preferred_element_type=jnp.float32)

    # tap k=0: x[2t-1] = odd rows shifted down by one (XLU sublane roll).
    # rolled[0] wraps around and is wrong; row 0 is fixed up below.
    rolled = pltpu.roll(x_odd, 1, 0)
    acc = acc + jnp.dot(rolled, w0_ref[...], preferred_element_type=jnp.float32)

    bias = b_ref[...]
    o_ref[...] = (acc + bias).astype(o_ref.dtype)

    # Row-0 fix-up: recompute the first output row with two 1-row matmuls and
    # overwrite it.  Cheaper than a full-tile iota/where/broadcast, and (unlike
    # adding a (prev - x_odd[TL-1]) correction to acc) immune to junk in the
    # Pallas-padded region of a ragged last tile, since it never reads row TL-1.
    prev_odd = halo_ref[7:8, c:]                                  # x[2*t0 - 1]
    prev_odd = jnp.where(j > 0, prev_odd, jnp.zeros_like(prev_odd))  # conv's left zero-pad
    row0 = jnp.dot(x2[0:1, :], w12_ref[...], preferred_element_type=jnp.float32)
    row0 = row0 + jnp.dot(prev_odd, w0_ref[...], preferred_element_type=jnp.float32)
    o_ref[0:1, :] = (row0 + bias).astype(o_ref.dtype)


def _avgpool_down_kernel(x2_ref, o_ref):
    """AvgPool1d(2) on one (batch, L-tile) block: lane-slice add, no strided loads."""
    c = o_ref.shape[-1]
    x_even = x2_ref[:, :c].astype(jnp.float32)
    x_odd = x2_ref[:, c:].astype(jnp.float32)
    o_ref[...] = ((x_even + x_odd) * 0.5).astype(o_ref.dtype)


# ----------------------------- wrappers ---------------------------------------

def prepack_conv_params(weight, bias):
    """PyTorch Conv1d weight (C_out, C_in, 3), bias (C_out,) -> (w0, w12, b_row).

    Channels-last callers should run this once outside the step function: the
    conv kernel is mem-bound at small/medium C, so per-call repacking and the
    NCL<->NLC transposes can cost as much as the kernel itself.
    """
    c = weight.shape[0]
    w0 = jnp.transpose(weight[:, :, 0])                               # (C_in, C_out)
    w12 = jnp.concatenate([jnp.transpose(weight[:, :, 1]),
                           jnp.transpose(weight[:, :, 2])], axis=0)   # (2C_in, C_out)
    b_row = bias.reshape(1, c).astype(jnp.float32)
    return w0, w12, b_row


def downsample_nlc(x_nlc, weight, bias, with_conv=True, l_tile=None):
    """Downsample on channels-last input (N, L, C) -> (N, L_out, C).

    Preferred entry point when the surrounding model is channels-last: no
    transpose round-trip and no full-array layout pass.
    """
    n, l, c = x_nlc.shape
    itemsize = jnp.dtype(x_nlc.dtype).itemsize

    if with_conv:
        l_out = (l - 1) // 2 + 1                 # floor((L + 2 - 3)/2) + 1
        if l % 2 == 1:                           # one trailing zero sample: L -> 2*l_out
            x_nlc = jnp.pad(x_nlc, ((0, 0), (0, 1), (0, 0)))
        x2 = x_nlc.reshape(n, l_out, 2 * c)      # pair rows; free reshape
        w0, w12, b_row = prepack_conv_params(weight, bias)

        tl = l_tile if l_tile is not None else _pick_l_tile(l_out, c, itemsize, True)
        tl = _align_tile(tl, l_out)
        bpt = max(tl // 8, 1)                    # 8-row halo blocks per L tile

        def halo_map(i, j):
            # last 8 rows of the previous L tile; clamp to block 0 when j == 0
            # (its contents are ignored -- the kernel substitutes the zero pad).
            return (i, jnp.maximum(j * bpt - 1, 0), 0)

        single_buf = c >= 256
        return pl.pallas_call(
            _conv_down_kernel,
            out_shape=jax.ShapeDtypeStruct((n, l_out, c), x_nlc.dtype),
            grid=(n, pl.cdiv(l_out, tl)),
            in_specs=[
                pl.BlockSpec((None, tl, 2 * c), lambda i, j: (i, j, 0)),
                pl.BlockSpec((None, 8, 2 * c), halo_map),
                _resident_spec((c, c), lambda i, j: (0, 0), single_buf),
                _resident_spec((2 * c, c), lambda i, j: (0, 0), single_buf),
                pl.BlockSpec((1, c), lambda i, j: (0, 0)),
            ],
            out_specs=pl.BlockSpec((None, tl, c), lambda i, j: (i, j, 0)),
            compiler_params=pltpu.CompilerParams(
                # Both axes are independent (the halo is re-fetched from HBM,
                # not carried), so v7x's two TensorCores can split either N
                # or L -- including the N=1 decode case.
                dimension_semantics=("parallel", "parallel"),
                vmem_limit_bytes=_VMEM_LIMIT),
        )(x2, x2, w0, w12, b_row)

    # with_conv=False: AvgPool1d(2)
    l_out = l // 2
    if l % 2 == 1:
        x_nlc = x_nlc[:, :2 * l_out, :]
    x2 = x_nlc.reshape(n, l_out, 2 * c)
    tl = l_tile if l_tile is not None else _pick_l_tile(l_out, c, itemsize, False)
    tl = _align_tile(tl, l_out)
    return pl.pallas_call(
        _avgpool_down_kernel,
        out_shape=jax.ShapeDtypeStruct((n, l_out, c), x_nlc.dtype),
        grid=(n, pl.cdiv(l_out, tl)),
        in_specs=[pl.BlockSpec((None, tl, 2 * c), lambda i, j: (i, j, 0))],
        out_specs=pl.BlockSpec((None, tl, c), lambda i, j: (i, j, 0)),
        compiler_params=pltpu.CompilerParams(
            dimension_semantics=("parallel", "parallel"),
            vmem_limit_bytes=_VMEM_LIMIT),
    )(x2)


@functools.partial(jax.jit, static_argnames=("with_conv", "l_tile"))
def downsample(x_ncl, weight, bias, with_conv=True, l_tile=None):
    """PyTorch-layout forward: x (N, C, L) -> (N, C, L_out).

    The two transposes are boundary glue for the NCL interface only; a
    channels-last caller should use `downsample_nlc` (+ `prepack_conv_params`
    hoisted out of the step) and skip both full HBM passes.
    """
    x_nlc = jnp.transpose(x_ncl, (0, 2, 1))
    out_nlc = downsample_nlc(x_nlc, weight, bias, with_conv=with_conv, l_tile=l_tile)
    return jnp.transpose(out_nlc, (0, 2, 1))


# ----------------------------- main -------------------------------------------

if __name__ == "__main__":
    key = jax.random.PRNGKey(0)
    k_x, k_w, k_b = jax.random.split(key, 3)

    def conv_ref(xs, w, b):
        return lax.conv_general_dilated(
            xs.astype(jnp.float32), w.astype(jnp.float32),
            window_strides=(2,), padding=[(1, 1)],
            dimension_numbers=("NCH", "OIH", "NCH"),
        ) + b.astype(jnp.float32)[None, :, None]

    def pool_ref(xs):
        lo = xs.shape[-1] // 2
        x32 = xs.astype(jnp.float32)
        return x32[:, :, :2 * lo].reshape(xs.shape[0], xs.shape[1], lo, 2).mean(-1)

    # --- toy shapes: N=2, C=4, L=16 ---
    N, C, L = 2, 4, 16
    x = jax.random.normal(k_x, (N, C, L), dtype=jnp.float32)
    weight = jax.random.normal(k_w, (C, C, 3), dtype=jnp.float32) * 0.1
    bias = jax.random.normal(k_b, (C,), dtype=jnp.float32) * 0.1

    out = jax.block_until_ready(downsample(x, weight, bias, with_conv=True))
    ref = conv_ref(x, weight, bias)
    assert out.shape == ref.shape, (out.shape, ref.shape)
    assert jnp.allclose(out, ref, atol=1e-5, rtol=1e-5), "conv mismatch"

    out_p = jax.block_until_ready(downsample(x, weight, bias, with_conv=False))
    assert jnp.allclose(out_p, pool_ref(x), atol=1e-5, rtol=1e-5), "pool mismatch"

    # --- odd L (exercises the trailing zero pad / truncation) ---
    x_o = jax.random.normal(k_x, (N, C, 15), dtype=jnp.float32)
    out_o = jax.block_until_ready(downsample(x_o, weight, bias, with_conv=True))
    assert jnp.allclose(out_o, conv_ref(x_o, weight, bias), atol=1e-4, rtol=1e-4), \
        "odd-L conv mismatch"
    out_op = jax.block_until_ready(downsample(x_o, weight, bias, with_conv=False))
    assert jnp.allclose(out_op, pool_ref(x_o), atol=1e-5, rtol=1e-5), "odd-L pool mismatch"

    # --- realistic channels, forced small tile: many L tiles -> exercises the
    #     halo fetch between adjacent tiles and the row-0 fix-up ---
    C2, L2 = 128, 2048
    x_l = jax.random.normal(k_x, (N, C2, L2), dtype=jnp.float32)
    w_l = jax.random.normal(k_w, (C2, C2, 3), dtype=jnp.float32) * 0.1
    b_l = jax.random.normal(k_b, (C2,), dtype=jnp.float32) * 0.1
    out_l = jax.block_until_ready(downsample(x_l, w_l, b_l, with_conv=True, l_tile=128))
    assert jnp.allclose(out_l, conv_ref(x_l, w_l, b_l), atol=1e-4, rtol=1e-4), \
        "multi-tile conv mismatch"
    out_lp = jax.block_until_ready(downsample(x_l, w_l, b_l, with_conv=False, l_tile=128))
    assert jnp.allclose(out_lp, pool_ref(x_l), atol=1e-5, rtol=1e-5), \
        "multi-tile pool mismatch"

    # --- default (adaptive) tiling on the same shapes ---
    out_d = jax.block_until_ready(downsample(x_l, w_l, b_l, with_conv=True))
    assert jnp.allclose(out_d, conv_ref(x_l, w_l, b_l), atol=1e-4, rtol=1e-4), \
        "default-tile conv mismatch"

    # --- bf16 activations + weights, N=1 (bf16 MXU path; grid fed by L alone) ---
    x_h = jax.random.normal(k_x, (1, C2, 1024), dtype=jnp.float32).astype(jnp.bfloat16)
    w_h = (jax.random.normal(k_w, (C2, C2, 3), dtype=jnp.float32) * 0.1).astype(jnp.bfloat16)
    b_h = (jax.random.normal(k_b, (C2,), dtype=jnp.float32) * 0.1).astype(jnp.bfloat16)
    out_h = jax.block_until_ready(downsample(x_h, w_h, b_h, with_conv=True))
    assert out_h.dtype == jnp.bfloat16
    assert jnp.allclose(out_h.astype(jnp.float32), conv_ref(x_h, w_h, b_h),
                        atol=6e-2, rtol=6e-2), "bf16 conv mismatch"

    print("KERNEL_OK")
</pallas_src>

<mosaic_0001>
module attributes {stable_mosaic.version = 11 : i64} {
  func.func @_conv_down_kernel(%arg0: i32, %arg1: i32, %arg2: memref<1x8x8xf32, #tpu.memory_space<vmem>>, %arg3: memref<1x8x8xf32, #tpu.memory_space<vmem>>, %arg4: memref<4x4xf32, #tpu.memory_space<vmem>>, %arg5: memref<8x4xf32, #tpu.memory_space<vmem>>, %arg6: memref<1x4xf32, #tpu.memory_space<vmem>>, %arg7: memref<1x8x4xf32, #tpu.memory_space<vmem>>) attributes {dimension_semantics = [#tpu.dimension_semantics<parallel>, #tpu.dimension_semantics<parallel>], iteration_bounds = array<i64: 2, 1>, scalar_prefetch = 0 : i64, scratch_operands = 0 : i64, tpu.core_type = #tpu.core_type<tc>, window_params = [{transform_indices = @transform_0, window_bounds = array<i64: 1, 8, 8>}, {transform_indices = @transform_1, window_bounds = array<i64: 1, 8, 8>}, {pipeline_mode = #tpu.pipeline_mode<synchronous>, transform_indices = @transform_2, window_bounds = array<i64: 4, 4>}, {pipeline_mode = #tpu.pipeline_mode<synchronous>, transform_indices = @transform_3, window_bounds = array<i64: 8, 4>}, {pipeline_mode = #tpu.pipeline_mode<synchronous>, transform_indices = @transform_4, window_bounds = array<i64: 1, 4>}, {transform_indices = @transform_5, window_bounds = array<i64: 1, 8, 4>}]} {
    %c0 = arith.constant 0 : index
    %c0_0 = arith.constant 0 : index
    %c0_1 = arith.constant 0 : index
    %0 = vector.load %arg2[%c0, %c0_0, %c0_1] : memref<1x8x8xf32, #tpu.memory_space<vmem>>, vector<1x8x8xf32>
    %1 = vector.shape_cast %0 : vector<1x8x8xf32> to vector<8x8xf32>
    %2 = vector.extract_strided_slice %1 {offsets = [0, 4], sizes = [8, 4], strides = [1, 1]} : vector<8x8xf32> to vector<8x4xf32>
    %c0_2 = arith.constant 0 : index
    %c0_3 = arith.constant 0 : index
    %3 = vector.load %arg5[%c0_2, %c0_3] : memref<8x4xf32, #tpu.memory_space<vmem>>, vector<8x4xf32>
    %cst = arith.constant dense<0.000000e+00> : vector<8x4xf32>
    %4 = tpu.matmul %1, %3, %cst {dimension_numbers = #tpu.dot_dimension_numbers<[1], [0], [0], [1], [0, 0, 1, 1], [], []>} : vector<8x8xf32>, vector<8x4xf32>, vector<8x4xf32> -> vector<8x4xf32>
    %c1_i32 = arith.constant 1 : i32
    %5 = tpu.dynamic_rotate %2 by %c1_i32 dim 0 : vector<8x4xf32>, i32 -> vector<8x4xf32>
    %c0_4 = arith.constant 0 : index
    %c0_5 = arith.constant 0 : index
    %6 = vector.load %arg4[%c0_4, %c0_5] : memref<4x4xf32, #tpu.memory_space<vmem>>, vector<4x4xf32>
    %cst_6 = arith.constant dense<0.000000e+00> : vector<8x4xf32>
    %7 = tpu.matmul %5, %6, %cst_6 {dimension_numbers = #tpu.dot_dimension_numbers<[1], [0], [0], [1], [0, 0, 1, 1], [], []>} : vector<8x4xf32>, vector<4x4xf32>, vector<8x4xf32> -> vector<8x4xf32>
    %8 = arith.addf %4, %7 : vector<8x4xf32>
    %c0_7 = arith.constant 0 : index
    %c0_8 = arith.constant 0 : index
    %9 = vector.load %arg6[%c0_7, %c0_8] : memref<1x4xf32, #tpu.memory_space<vmem>>, vector<1x4xf32>
    %10 = vector.broadcast %9 : vector<1x4xf32> to vector<8x4xf32>
    %11 = arith.addf %8, %10 : vector<8x4xf32>
    %c0_9 = arith.constant 0 : index
    %c0_10 = arith.constant 0 : index
    %c0_11 = arith.constant 0 : index
    %12 = vector.load %arg7[%c0_9, %c0_10, %c0_11] : memref<1x8x4xf32, #tpu.memory_space<vmem>>, vector<1x8x4xf32>
    %13 = vector.shape_cast %12 : vector<1x8x4xf32> to vector<8x4xf32>
    %14 = vector.shape_cast %11 : vector<8x4xf32> to vector<1x8x4xf32>
    tpu.vector_store %arg7[%c0_9, %c0_10, %c0_11], %14 {strides = array<i32>} : memref<1x8x4xf32, #tpu.memory_space<vmem>>, vector<1x8x4xf32>,
    %c0_12 = arith.constant 0 : index
    %c7 = arith.constant 7 : index
    %c4 = arith.constant 4 : index
    %15 = vector.load %arg3[%c0_12, %c7, %c4] : memref<1x8x8xf32, #tpu.memory_space<vmem>>, vector<1x1x4xf32>
    %16 = vector.shape_cast %15 : vector<1x1x4xf32> to vector<1x4xf32>
    %c0_i32 = arith.constant 0 : i32
    %17 = arith.cmpi sgt, %arg1, %c0_i32 : i32
    %cst_13 = arith.constant 0.000000e+00 : f32
    %18 = vector.broadcast %cst_13 : f32 to vector<1x4xf32>
    %19 = arith.select %17, %16, %18 : vector<1x4xf32>
    %20 = vector.extract_strided_slice %1 {offsets = [0, 0], sizes = [1, 8], strides = [1, 1]} : vector<8x8xf32> to vector<1x8xf32>
    %c0_14 = arith.constant 0 : index
    %c0_15 = arith.constant 0 : index
    %21 = vector.load %arg5[%c0_14, %c0_15] : memref<8x4xf32, #tpu.memory_space<vmem>>, vector<8x4xf32>
    %cst_16 = arith.constant dense<0.000000e+00> : vector<1x4xf32>
    %22 = tpu.matmul %20, %21, %cst_16 {dimension_numbers = #tpu.dot_dimension_numbers<[1], [0], [0], [1], [0, 0, 1, 1], [], []>} : vector<1x8xf32>, vector<8x4xf32>, vector<1x4xf32> -> vector<1x4xf32>
    %c0_17 = arith.constant 0 : index
    %c0_18 = arith.constant 0 : index
    %23 = vector.load %arg4[%c0_17, %c0_18] : memref<4x4xf32, #tpu.memory_space<vmem>>, vector<4x4xf32>
    %cst_19 = arith.constant dense<0.000000e+00> : vector<1x4xf32>
    %24 = tpu.matmul %19, %23, %cst_19 {dimension_numbers = #tpu.dot_dimension_numbers<[1], [0], [0], [1], [0, 0, 1, 1], [], []>} : vector<1x4xf32>, vector<4x4xf32>, vector<1x4xf32> -> vector<1x4xf32>
    %25 = arith.addf %22, %24 : vector<1x4xf32>
    %26 = arith.addf %25, %9 : vector<1x4xf32>
    %c0_20 = arith.constant 0 : index
    %c0_21 = arith.constant 0 : index
    %c0_22 = arith.constant 0 : index
    %27 = vector.load %arg7[%c0_20, %c0_21, %c0_22] : memref<1x8x4xf32, #tpu.memory_space<vmem>>, vector<1x1x4xf32>
    %28 = vector.shape_cast %27 : vector<1x1x4xf32> to vector<1x4xf32>
    %29 = vector.shape_cast %26 : vector<1x4xf32> to vector<1x1x4xf32>
    tpu.vector_store %arg7[%c0_20, %c0_21, %c0_22], %29 {strides = array<i32>} : memref<1x8x4xf32, #tpu.memory_space<vmem>>, vector<1x1x4xf32>,
    return
  }
  func.func @transform_0(%arg0: i32, %arg1: i32) -> (i32, i32, i32) {
    %c0_i32 = arith.constant 0 : i32
    %c0_i32_0 = arith.constant 0 : i32
    return %arg0, %arg1, %c0_i32 : i32, i32, i32
  }
  func.func @transform_1(%arg0: i32, %arg1: i32) -> (i32, i32, i32) {
    %c1_i32 = arith.constant 1 : i32
    %0 = arith.muli %arg1, %c1_i32 : i32
    %c1_i32_0 = arith.constant 1 : i32
    %1 = arith.subi %0, %c1_i32_0 : i32
    %c0_i32 = arith.constant 0 : i32
    %2 = arith.maxsi %1, %c0_i32 : i32
    %c0_i32_1 = arith.constant 0 : i32
    %c0_i32_2 = arith.constant 0 : i32
    return %arg0, %2, %c0_i32_1 : i32, i32, i32
  }
  func.func @transform_2(%arg0: i32, %arg1: i32) -> (i32, i32) {
    %c0_i32 = arith.constant 0 : i32
    %c0_i32_0 = arith.constant 0 : i32
    %c0_i32_1 = arith.constant 0 : i32
    return %c0_i32, %c0_i32_0 : i32, i32
  }
  func.func @transform_3(%arg0: i32, %arg1: i32) -> (i32, i32) {
    %c0_i32 = arith.constant 0 : i32
    %c0_i32_0 = arith.constant 0 : i32
    %c0_i32_1 = arith.constant 0 : i32
    return %c0_i32, %c0_i32_0 : i32, i32
  }
  func.func @transform_4(%arg0: i32, %arg1: i32) -> (i32, i32) {
    %c0_i32 = arith.constant 0 : i32
    %c0_i32_0 = arith.constant 0 : i32
    %c0_i32_1 = arith.constant 0 : i32
    return %c0_i32, %c0_i32_0 : i32, i32
  }
  func.func @transform_5(%arg0: i32, %arg1: i32) -> (i32, i32, i32) {
    %c0_i32 = arith.constant 0 : i32
    %c0_i32_0 = arith.constant 0 : i32
    return %arg0, %arg1, %c0_i32 : i32, i32, i32
  }
}

</mosaic_0001>

<bundles_post_ra>
// kernel: downsample.1
= control target key start
LH: loop header
LB: loop body
LE: loop exit
PB: predicated region body
PF: predicated region fallthrough
CT: control target
= control target key end

     0   :  { %s844_s18 = smov 0   ;;  %s846_s19 = smov 0   ;;  %s905_s0 = inlined_call_operand.vmem [shape: f32[2,8,8], index: 0, kind: input, shape index: {}, may-alias: {0,1}]   ;;  %s906_s1 = inlined_call_operand.vmem [shape: f32[2,8,8], index: 1, kind: input, shape index: {}, may-alias: {0,1}]   ;;  %s907_s2 = inlined_call_operand.vmem [shape: f32[4,4], index: 2, kind: input, shape index: {}]   ;;  %s908_s3 = inlined_call_operand.vmem [shape: f32[8,4], index: 3, kind: input, shape index: {}]   ;;  %s909_s4 = inlined_call_operand.vmem [shape: f32[1,4], index: 4, kind: input, shape index: {}]   ;;  %s910_s5 = inlined_call_operand.vmem [shape: f32[2,8,4], index: 5, kind: output, shape index: {}]  }
   0x1   :  { %s848_s20 = smov 0  }
   0x2 LB: > { %s27_s1 = sadd.s32 1, %s805_s19  ;;  %p720_p0 = scmp.ge.s32.totalorder %s809_s20, 1  ;;  %s809_s20 = sphi %s848_s20, %s15_s20   ;;  %s805_s19 = sphi %s846_s19, %s912_s19   ;;  %s801_s18 = sphi %s844_s18, %s911_s18  }
   0x3   : > { %p29_p1 = scmp.ge.s32.totalorder %s27_s1, 2  ;;  %p231_p2 = scmp.lt.s32.totalorder %s809_s20, 3 }
   0x5   : > { %s914_s1 = smov (%p29_p1, %s27_s1), 0  ;;  %p232_p3 = pnand %p720_p0, %p231_p2 }
   0x6   : > { %p273_p4 = scmp.lt.s32.totalorder (!%p232_p3), %s801_s18, 1  ;;  %s813_s29 = smov (!%p232_p3), 124  }
   0x7   : > { %235 = sbr.rel (%p232_p3) target bundleno = 336 (0x150), region = 40 }
   0xc   : > { %v301_v0 = vld [vmem:[%s908_s3] sm:$0xff]  ;;  %vm312_vm0 = vcmask 1043456   ;;  %v811_v1 = vmov 0.0   ;;  %s916_s18 = smov (!%p273_p4, %s801_s18), 1  ;;  %vm812_vm1 = vmmov 0   ;;  %vm386_vm2 = vcmask 64512  }
   0xd   : > { %745 = vmatprep.subr.mxu1 %v811_v1  ;;  %740 = vmatprep.subr.mxu0 %v811_v1  ;;  %v307_v2 = vld [vmem:[%s907_s2] sm:$0xf]  ;;  %s721_s25 = sshll.u32 %s916_s18, 3  ;;  %vm308_vm3 = vcmask 31744   ;;  %v461_v12 = vlaneseq  ;;  %vm625_vm4 = vcmask 24576  }
   0xe   : > { %746 = vmatpush3.msra.mxu1 %v301_v0  ;;  %747 = vmatprep.mubr.msk.f32.mxu1 %vm812_vm1, %v811_v1  ;;  %s279_s28 = scalar_lea.vmem %s905_s0, %s721_s25  ;;  %v475_v6 = vld [vmem:[%s907_s2] sm:$0xf]  ;;  %s299_s11 = scalar_lea.vmem %s910_s5, %s721_s25 }
   0xf   : > { %741 = vmatpush3.msk.msra.mxu0 %vm312_vm0, %v307_v2  ;;  %742 = vmatprep.mubr.msk.f32.mxu0 %vm812_vm1, %v811_v1  ;;  %v300_v3 = vld [vmem:[%s279_s28] sm:$0xff]  ;;  %v462_v13 = vshrl.u32 %v461_v12, 7 }
  0x10   : > { %750 = vmatprep.subr.mxu0 %v811_v1  ;;  %755 = vmatprep.subr.mxu1 %v811_v1  ;;  %v459_v15 = vld [vmem:[%s909_s4] sm:$0x1] }
  0x11   : > { %303 = vrot.lane.b32.xlu0 %v300_v3, %s813_s29  ;;  %748 = vmatmul.mubr.msk.f32.vlgmr.msra.gmra.mxu1 %vm386_vm2, %v300_v3  ;;  %v463_v14 = vsub.s32 0, %v462_v13 }
  0x12   : > { %756 = vmatpush3.msra.mxu1 %v301_v0  ;;  %757 = vmatprep.mubr.msk.f32.mxu1 %vm812_vm1, %v811_v1 }
  0x13   : > { %v464_v16 = vrot.slane %v459_v15, %v463_v14 }
  0x15   : > { %477 = vrot.lane.b32.xlu0 %v811_v1, %s813_s29  ;;  %758 = vmatmul.mubr.msk.f32.vlgmr.msra.gmra.mxu1 %vm386_vm2, %v300_v3 }
  0x83   : > { %v304_v4 = vpop.permute.xlu0 %303 }
  0x84   : > { %v306_v5 = vrot.slane %v304_v4, 7 }
  0x86   : > { %743 = vmatmul.mubr.msk.f32.vlgmr.msra.gmra.mxu0 %vm308_vm3, %v306_v5 }
  0x87   : > { %751 = vmatpush3.msk.msra.mxu0 %vm312_vm0, %v475_v6  ;;  %752 = vmatprep.mubr.msk.f32.mxu0 %vm812_vm1, %v811_v1  ;;  %v478_v7 = vpop.permute.xlu0 %477 }
  0x8a   : > { %753 = vmatmul.mubr.msk.f32.vlgmr.msra.gmra.mxu0 %vm308_vm3, %v478_v7 }
  0xd1   : > { %v455_v8 = vpop.f32.mrf.mxu1 }
  0xd3   : > { %v749_v9 = vpop.f32.mrf.mxu1 }
  0xd5   : > { %v620_v10 = vpop.f32.mrf.mxu1 }
  0xd7   : > { %v759_v11 = vpop.f32.mrf.mxu1 }
 0x146   : > { %v382_v17 = vpop.f32.mrf.mxu0 }
 0x147   : > { %v456_v18 = vadd.f32 %v455_v8, %v382_v17 }
 0x148   : > { %v744_v19 = vpop.f32.mrf.mxu0 }
 0x149   : > { %v466_v20 = vadd.f32 %v464_v16, %v456_v18 }
 0x14a   : > { %v550_v21 = vpop.f32.mrf.mxu0 }
 0x14b   : > { %467 = vst.msk [vmem:[%s299_s11] sm:$0xff] %vm308_vm3, %v466_v20  ;;  %v621_v22 = vadd.f32 %v620_v10, %v550_v21 }
 0x14c   : > { %v754_v23 = vpop.f32.mrf.mxu0 }
 0x14d   : > { %v624_v24 = vadd.f32 %v621_v22, %v459_v15 }
 0x14f   : > { %626 = vst.msk [vmem:[%s299_s11] sm:$0x1] %vm625_vm4, %v624_v24 }
 0x150 PF: > { %s15_s20 = sadd.s32 1, %s809_s20   ;;  %s911_s18 = smov %s805_s19 }
 0x151   : > { %p12_p5 = scmp.ge.s32.totalorder %s15_s20, 4   ;;  %s912_s19 = smov %s914_s1 }
 0x153   :  { %14 = sbr.rel (!%p12_p5) target bundleno = 2 (0x2), region = 73 }

</bundles_post_ra>
